<compile_context>
chip_gen: v7x
topology: tpu7x:2x2x1
jax: 0.10.0
libtpu: 0.0.40
codegen_flags: <defaults>
</compile_context>

<pallas_src>
import functools

import jax
import jax.numpy as jnp
from jax import lax
from jax.experimental import pallas as pl
from jax.experimental.pallas import tpu as pltpu


def _dgd_kernel(seed_ref, x_ref, z_ref, kl_ref, *, C, HW, compute_dtype):
    b = pl.program_id(0)
    cb = pl.program_id(1)
    lb = pl.program_id(2)

    c_tile = x_ref.shape[2]
    l_tile = x_ref.shape[3]

    # ---- mean / logvar halves of this tile (split handled by the BlockSpec) ----
    mean = x_ref[0, 0].astype(compute_dtype)
    logvar = jnp.clip(x_ref[0, 1].astype(compute_dtype), -30.0, 20.0)
    std = jnp.exp(logvar * 0.5)                 # the only EUP transcendental

    # ---- N(0,1) noise: counter hash (VPU int ops) + CLT(4) --------------------
    # Grid-invariant & deterministic: value depends only on (seed, global index).
    row = lax.broadcasted_iota(jnp.int32, (c_tile, l_tile), 0)
    col = lax.broadcasted_iota(jnp.int32, (c_tile, l_tile), 1)
    gidx = ((b * C + cb * c_tile + row) * HW + (lb * l_tile + col)).astype(jnp.uint32)
    smix = seed_ref[0].astype(jnp.uint32) * jnp.uint32(0x9E3779B9)

    def _hash32(v):                              # lowbias32 integer hash
        v = v ^ (v >> 16)
        v = v * jnp.uint32(0x7FEB352D)
        v = v ^ (v >> 15)
        v = v * jnp.uint32(0x846CA68B)
        v = v ^ (v >> 16)
        return v

    h0 = _hash32(gidx * jnp.uint32(2) + smix)
    h1 = _hash32(gidx * jnp.uint32(2) + jnp.uint32(1) + smix)
    u0 = (h0 >> 16).astype(jnp.float32)
    u1 = (h0 & jnp.uint32(0xFFFF)).astype(jnp.float32)
    u2 = (h1 >> 16).astype(jnp.float32)
    u3 = (h1 & jnp.uint32(0xFFFF)).astype(jnp.float32)
    # Irwin-Hall(4): sum of four U(0,1) has mean 2 and variance 1/3.
    noise = ((u0 + u1 + u2 + u3) * jnp.float32(1.0 / 65536.0) - jnp.float32(2.0)) \
            * jnp.float32(1.7320508075688772)

    # ---- z = mean + std * eps --------------------------------------------------
    z_ref[0] = (mean + std * noise.astype(compute_dtype)).astype(z_ref.dtype)

    # ---- per-tile KL partial in f32; one independent output cell per grid step -
    mean32 = mean.astype(jnp.float32)
    logvar32 = logvar.astype(jnp.float32)
    std32 = std.astype(jnp.float32)
    kl_terms = mean32 * mean32 + std32 * std32 - 1.0 - logvar32   # var = std*std
    kl_ref[...] = jnp.sum(kl_terms).reshape(kl_ref.shape)


def _sublane_multiple(dtype):
    """Native sublane multiple: 8 for 32-bit, 16 for bf16/f16, 32 for int8/fp8."""
    bits = jnp.dtype(dtype).itemsize * 8
    return max(8, (32 // bits) * 8)


def _largest_aligned_divisor(n, cap, align):
    """Largest divisor of n that is a multiple of `align` and <= cap (or None)."""
    best = None
    d = align
    limit = min(n, cap)
    while d <= limit:
        if n % d == 0:
            best = d
        d += align
    return best


def _choose_tiles(C, HW, itemsize, budget_bytes, sub):
    """Pick (c_tile, l_tile) for one mean/logvar plane under a byte budget."""
    if C * HW * itemsize <= budget_bytes:
        return C, HW                                   # whole per-batch plane
    # Candidate A: full lane extent (long contiguous DMA rows), tile channels.
    cand_a = None
    cap_c = budget_bytes // max(1, HW * itemsize)
    c_div = _largest_aligned_divisor(C, cap_c, sub)
    if c_div is not None:
        cand_a = (c_div, HW)
    # Candidate B: full channel extent, tile the lane axis (multiple of 128).
    cand_b = None
    cap_l = budget_bytes // max(1, C * itemsize)
    l_div = _largest_aligned_divisor(HW, cap_l, 128)
    if l_div is not None:
        cand_b = (C, l_div)
    if cand_a is None and cand_b is None:
        # Degenerate: budget below any aligned tile; take the smallest legal tile.
        return (sub if C % sub == 0 else C), 128
    if cand_a is None:
        return cand_b
    if cand_b is None:
        return cand_a
    # Prefer the full-lane candidate unless it collapsed far below the lane-tiled one.
    return cand_a if 2 * cand_a[0] * cand_a[1] >= cand_b[0] * cand_b[1] else cand_b


def _vmem_budget():
    try:
        vmem_cap = int(pltpu.get_tpu_info().vmem_capacity_bytes)
    except Exception:  # CPU / interpret mode or query unavailable
        vmem_cap = 64 * 1024 * 1024          # conservative (v7x-sized) fallback
    vmem_limit = int(min(vmem_cap // 2, 64 * 1024 * 1024))
    # Working set: 2 input planes + 1 output plane, double-buffered (6 planes at
    # the input itemsize) plus ~5 full-tile f32 intermediates that Mosaic may
    # materialize -> count ~12 f32-equivalent planes against the scoped limit.
    plane_cap = (2 << 20) if vmem_cap <= (64 << 20) else (6 << 20)
    tile_budget = int(max(256 << 10, min(vmem_limit // 12, plane_cap)))
    return vmem_limit, tile_budget


def diagonal_gaussian_distribution(x, seed=0, tile_override=None):
    """Pallas implementation of DiagonalGaussianDistribution.forward.

    x: [B, 2C, H, W] (NCHW).  Returns (z [B, C, H, W], kl scalar).
    """
    B, C2, H, W = x.shape
    assert C2 % 2 == 0, "channel axis must hold (mean, logvar) halves"
    C = C2 // 2
    HW = H * W
    assert HW % 128 == 0, "H*W must be a multiple of 128 for lane-dense layout"

    # Free (row-major) reshape: [B, 2C, H, W] -> [B, 2, C, H*W].
    x4 = x.reshape(B, 2, C, HW)
    itemsize = jnp.dtype(x.dtype).itemsize
    compute_dtype = jnp.bfloat16 if x.dtype == jnp.bfloat16 else jnp.float32

    vmem_limit, tile_budget = _vmem_budget()
    if tile_override is not None:
        c_tile, l_tile = tile_override
    else:
        c_tile, l_tile = _choose_tiles(C, HW, itemsize, tile_budget,
                                       _sublane_multiple(x.dtype))
    assert C % c_tile == 0 and HW % l_tile == 0
    n_cb = C // c_tile
    n_lb = HW // l_tile

    # index_maps receive the scalar-prefetch ref (seed) as a trailing arg.
    x_spec = pl.BlockSpec((1, 2, c_tile, l_tile), lambda b, cb, lb, s: (b, 0, cb, lb))
    z_spec = pl.BlockSpec((1, c_tile, l_tile), lambda b, cb, lb, s: (b, cb, lb))
    kl_spec = pl.BlockSpec((1, 1, 1, 1, 1), lambda b, cb, lb, s: (b, cb, lb, 0, 0))

    seed_arr = jnp.asarray(seed, dtype=jnp.int32).reshape((1,))

    z_flat, kl_parts = pl.pallas_call(
        functools.partial(_dgd_kernel, C=C, HW=HW, compute_dtype=compute_dtype),
        out_shape=(
            jax.ShapeDtypeStruct((B, C, HW), x.dtype),
            jax.ShapeDtypeStruct((B, n_cb, n_lb, 1, 1), jnp.float32),
        ),
        grid_spec=pltpu.PrefetchScalarGridSpec(
            num_scalar_prefetch=1,
            grid=(B, n_cb, n_lb),
            in_specs=[x_spec],
            out_specs=(z_spec, kl_spec),
        ),
        compiler_params=pltpu.CompilerParams(
            # No cross-step accumulation -> every axis independent (keeps both
            # v7x TensorCores busy even for B == 1 / single channel block).
            dimension_semantics=("parallel", "parallel", "parallel"),
            vmem_limit_bytes=vmem_limit,
        ),
    )(seed_arr, x4)

    z = z_flat.reshape(B, C, H, W)
    kl = 0.5 * jnp.sum(kl_parts) / B   # tiny final reduce + scale hoisted to wrapper
    return z, kl


def _reference(x, z):
    """Pure-JAX reference: exact KL, and the implied noise for a stats check."""
    B, C2, H, W = x.shape
    C = C2 // 2
    mean = x[:, :C].astype(jnp.float32)
    logvar = jnp.clip(x[:, C:].astype(jnp.float32), -30.0, 20.0)
    std = jnp.exp(0.5 * logvar)
    var = jnp.exp(logvar)
    kl = 0.5 * jnp.sum(mean * mean + var - 1.0 - logvar) / B
    noise_hat = (z.astype(jnp.float32) - mean) / std
    return kl, noise_hat


if __name__ == "__main__":
    key = jax.random.PRNGKey(0)

    # --- case 1: module-sized input, default (single-tile) path, jitted --------
    B, C, H, W = 2, 4, 16, 16
    x = jax.random.normal(key, (B, 2 * C, H, W), dtype=jnp.float32)
    fwd = jax.jit(diagonal_gaussian_distribution)
    z, kl = jax.block_until_ready(fwd(x, 0))

    kl_ref, noise_hat = _reference(x, z)
    assert z.shape == (B, C, H, W) and z.dtype == x.dtype
    assert bool(jnp.all(jnp.isfinite(z)))
    # KL does not depend on the sample -> exact check against the reference.
    assert jnp.allclose(kl, kl_ref, rtol=1e-4, atol=1e-3), (float(kl), float(kl_ref))
    # TODO(synk): bitwise parity with torch.randn is not reproducible; the in-kernel
    # CLT(4) normal approximation also truncates tails at ~3.46 sigma.
    assert abs(float(jnp.mean(noise_hat))) < 0.25
    assert abs(float(jnp.std(noise_hat)) - 1.0) < 0.25

    # --- case 2: multi-tile grid (n_cb > 1, n_lb > 1) + grid-invariance --------
    key2 = jax.random.PRNGKey(1)
    B2, C2h, H2, W2 = 2, 16, 16, 32
    x2 = jax.random.normal(key2, (B2, 2 * C2h, H2, W2), dtype=jnp.float32)
    z_a, kl_a = diagonal_gaussian_distribution(x2, 123, tile_override=(8, 256))
    z_b, kl_b = diagonal_gaussian_distribution(x2, 123, tile_override=(16, 512))
    jax.block_until_ready((z_a, z_b))
    kl2_ref, noise_hat2 = _reference(x2, z_a)
    assert jnp.allclose(kl_a, kl2_ref, rtol=1e-4, atol=1e-3)
    assert jnp.allclose(kl_b, kl2_ref, rtol=1e-4, atol=1e-3)
    # Noise is a pure function of (seed, global element index): identical across tilings.
    assert bool(jnp.array_equal(z_a, z_b))
    assert abs(float(jnp.mean(noise_hat2))) < 0.2
    assert abs(float(jnp.std(noise_hat2)) - 1.0) < 0.2

    print("KERNEL_OK")
</pallas_src>

<mosaic_0001>
module attributes {stable_mosaic.version = 11 : i64} {
  func.func @_dgd_kernel(%arg0: i32, %arg1: i32, %arg2: i32, %arg3: memref<1xi32, #tpu.memory_space<smem>>, %arg4: memref<1x2x4x256xf32, #tpu.memory_space<vmem>>, %arg5: memref<1x4x256xf32, #tpu.memory_space<vmem>>, %arg6: memref<1x1x1x1x1xf32, #tpu.memory_space<vmem>>) attributes {dimension_semantics = [#tpu.dimension_semantics<parallel>, #tpu.dimension_semantics<parallel>, #tpu.dimension_semantics<parallel>], iteration_bounds = array<i64: 2, 1, 1>, scalar_prefetch = 1 : i64, scratch_operands = 0 : i64, tpu.core_type = #tpu.core_type<tc>, window_params = [{transform_indices = @transform_0, window_bounds = array<i64: 1, 2, 4, 256>}, {transform_indices = @transform_1, window_bounds = array<i64: 1, 4, 256>}, {transform_indices = @transform_2, window_bounds = array<i64: 1, 1, 1, 1, 1>}]} {
    %c0 = arith.constant 0 : index
    %c0_0 = arith.constant 0 : index
    %c0_1 = arith.constant 0 : index
    %c0_2 = arith.constant 0 : index
    %0 = vector.load %arg4[%c0, %c0_0, %c0_1, %c0_2] : memref<1x2x4x256xf32, #tpu.memory_space<vmem>>, vector<1x1x4x256xf32>
    %1 = vector.shape_cast %0 : vector<1x1x4x256xf32> to vector<4x256xf32>
    %c0_3 = arith.constant 0 : index
    %c1 = arith.constant 1 : index
    %c0_4 = arith.constant 0 : index
    %c0_5 = arith.constant 0 : index
    %2 = vector.load %arg4[%c0_3, %c1, %c0_4, %c0_5] : memref<1x2x4x256xf32, #tpu.memory_space<vmem>>, vector<1x1x4x256xf32>
    %3 = vector.shape_cast %2 : vector<1x1x4x256xf32> to vector<4x256xf32>
    %cst = arith.constant -3.000000e+01 : f32
    %cst_6 = arith.constant 2.000000e+01 : f32
    %4 = vector.broadcast %cst : f32 to vector<4x256xf32>
    %5 = arith.maximumf %4, %3 : vector<4x256xf32>
    %6 = vector.broadcast %cst_6 : f32 to vector<4x256xf32>
    %7 = arith.minimumf %6, %5 : vector<4x256xf32>
    %cst_7 = arith.constant 5.000000e-01 : f32
    %8 = vector.broadcast %cst_7 : f32 to vector<4x256xf32>
    %9 = arith.mulf %7, %8 : vector<4x256xf32>
    %10 = math.exp %9 : vector<4x256xf32>
    %11 = tpu.iota {dimensions = array<i32: 0>} : vector<4x256xi32>
    %12 = tpu.iota {dimensions = array<i32: 1>} : vector<4x256xi32>
    %c4_i32 = arith.constant 4 : i32
    %13 = arith.muli %arg0, %c4_i32 : i32
    %c4_i32_8 = arith.constant 4 : i32
    %14 = arith.muli %arg1, %c4_i32_8 : i32
    %15 = arith.addi %13, %14 : i32
    %16 = vector.broadcast %15 : i32 to vector<4x256xi32>
    %17 = arith.addi %16, %11 : vector<4x256xi32>
    %c256_i32 = arith.constant 256 : i32
    %18 = vector.broadcast %c256_i32 : i32 to vector<4x256xi32>
    %19 = arith.muli %17, %18 : vector<4x256xi32>
    %c256_i32_9 = arith.constant 256 : i32
    %20 = arith.muli %arg2, %c256_i32_9 : i32
    %21 = vector.broadcast %20 : i32 to vector<4x256xi32>
    %22 = arith.addi %21, %12 : vector<4x256xi32>
    %23 = arith.addi %19, %22 : vector<4x256xi32>
    %c0_10 = arith.constant 0 : index
    %24 = memref.load %arg3[%c0_10] : memref<1xi32, #tpu.memory_space<smem>>
    %c-1640531527_i32 = arith.constant -1640531527 : i32
    %25 = arith.muli %24, %c-1640531527_i32 : i32
    %c2_i32 = arith.constant 2 : i32
    %26 = vector.broadcast %c2_i32 : i32 to vector<4x256xi32>
    %27 = arith.muli %23, %26 : vector<4x256xi32>
    %28 = vector.broadcast %25 : i32 to vector<4x256xi32>
    %29 = arith.addi %27, %28 : vector<4x256xi32>
    %c16_i32 = arith.constant 16 : i32
    %30 = vector.broadcast %c16_i32 : i32 to vector<4x256xi32>
    %31 = arith.shrui %29, %30 : vector<4x256xi32>
    %32 = arith.xori %29, %31 : vector<4x256xi32>
    %c2146121005_i32 = arith.constant 2146121005 : i32
    %33 = vector.broadcast %c2146121005_i32 : i32 to vector<4x256xi32>
    %34 = arith.muli %32, %33 : vector<4x256xi32>
    %c15_i32 = arith.constant 15 : i32
    %35 = vector.broadcast %c15_i32 : i32 to vector<4x256xi32>
    %36 = arith.shrui %34, %35 : vector<4x256xi32>
    %37 = arith.xori %34, %36 : vector<4x256xi32>
    %c-2073254261_i32 = arith.constant -2073254261 : i32
    %38 = vector.broadcast %c-2073254261_i32 : i32 to vector<4x256xi32>
    %39 = arith.muli %37, %38 : vector<4x256xi32>
    %c16_i32_11 = arith.constant 16 : i32
    %40 = vector.broadcast %c16_i32_11 : i32 to vector<4x256xi32>
    %41 = arith.shrui %39, %40 : vector<4x256xi32>
    %42 = arith.xori %39, %41 : vector<4x256xi32>
    %c2_i32_12 = arith.constant 2 : i32
    %43 = vector.broadcast %c2_i32_12 : i32 to vector<4x256xi32>
    %44 = arith.muli %23, %43 : vector<4x256xi32>
    %c1_i32 = arith.constant 1 : i32
    %45 = vector.broadcast %c1_i32 : i32 to vector<4x256xi32>
    %46 = arith.addi %44, %45 : vector<4x256xi32>
    %47 = vector.broadcast %25 : i32 to vector<4x256xi32>
    %48 = arith.addi %46, %47 : vector<4x256xi32>
    %c16_i32_13 = arith.constant 16 : i32
    %49 = vector.broadcast %c16_i32_13 : i32 to vector<4x256xi32>
    %50 = arith.shrui %48, %49 : vector<4x256xi32>
    %51 = arith.xori %48, %50 : vector<4x256xi32>
    %c2146121005_i32_14 = arith.constant 2146121005 : i32
    %52 = vector.broadcast %c2146121005_i32_14 : i32 to vector<4x256xi32>
    %53 = arith.muli %51, %52 : vector<4x256xi32>
    %c15_i32_15 = arith.constant 15 : i32
    %54 = vector.broadcast %c15_i32_15 : i32 to vector<4x256xi32>
    %55 = arith.shrui %53, %54 : vector<4x256xi32>
    %56 = arith.xori %53, %55 : vector<4x256xi32>
    %c-2073254261_i32_16 = arith.constant -2073254261 : i32
    %57 = vector.broadcast %c-2073254261_i32_16 : i32 to vector<4x256xi32>
    %58 = arith.muli %56, %57 : vector<4x256xi32>
    %c16_i32_17 = arith.constant 16 : i32
    %59 = vector.broadcast %c16_i32_17 : i32 to vector<4x256xi32>
    %60 = arith.shrui %58, %59 : vector<4x256xi32>
    %61 = arith.xori %58, %60 : vector<4x256xi32>
    %c16_i32_18 = arith.constant 16 : i32
    %62 = vector.broadcast %c16_i32_18 : i32 to vector<4x256xi32>
    %63 = arith.shrui %42, %62 : vector<4x256xi32>
    %64 = arith.uitofp %63 : vector<4x256xi32> to vector<4x256xf32>
    %c65535_i32 = arith.constant 65535 : i32
    %65 = vector.broadcast %c65535_i32 : i32 to vector<4x256xi32>
    %66 = arith.andi %42, %65 : vector<4x256xi32>
    %67 = arith.uitofp %66 : vector<4x256xi32> to vector<4x256xf32>
    %c16_i32_19 = arith.constant 16 : i32
    %68 = vector.broadcast %c16_i32_19 : i32 to vector<4x256xi32>
    %69 = arith.shrui %61, %68 : vector<4x256xi32>
    %70 = arith.uitofp %69 : vector<4x256xi32> to vector<4x256xf32>
    %c65535_i32_20 = arith.constant 65535 : i32
    %71 = vector.broadcast %c65535_i32_20 : i32 to vector<4x256xi32>
    %72 = arith.andi %61, %71 : vector<4x256xi32>
    %73 = arith.uitofp %72 : vector<4x256xi32> to vector<4x256xf32>
    %74 = arith.addf %64, %67 : vector<4x256xf32>
    %75 = arith.addf %74, %70 : vector<4x256xf32>
    %76 = arith.addf %75, %73 : vector<4x256xf32>
    %cst_21 = arith.constant 1.52587891E-5 : f32
    %77 = vector.broadcast %cst_21 : f32 to vector<4x256xf32>
    %78 = arith.mulf %76, %77 : vector<4x256xf32>
    %cst_22 = arith.constant 2.000000e+00 : f32
    %79 = vector.broadcast %cst_22 : f32 to vector<4x256xf32>
    %80 = arith.subf %78, %79 : vector<4x256xf32>
    %cst_23 = arith.constant 1.73205078 : f32
    %81 = vector.broadcast %cst_23 : f32 to vector<4x256xf32>
    %82 = arith.mulf %80, %81 : vector<4x256xf32>
    %83 = arith.mulf %10, %82 : vector<4x256xf32>
    %84 = arith.addf %1, %83 : vector<4x256xf32>
    %c0_24 = arith.constant 0 : index
    %c0_25 = arith.constant 0 : index
    %c0_26 = arith.constant 0 : index
    %85 = vector.load %arg5[%c0_24, %c0_25, %c0_26] : memref<1x4x256xf32, #tpu.memory_space<vmem>>, vector<1x4x256xf32>
    %86 = vector.shape_cast %85 : vector<1x4x256xf32> to vector<4x256xf32>
    %87 = vector.shape_cast %84 : vector<4x256xf32> to vector<1x4x256xf32>
    tpu.vector_store %arg5[%c0_24, %c0_25, %c0_26], %87 {strides = array<i32>} : memref<1x4x256xf32, #tpu.memory_space<vmem>>, vector<1x4x256xf32>,
    %88 = arith.mulf %1, %1 : vector<4x256xf32>
    %89 = arith.mulf %10, %10 : vector<4x256xf32>
    %90 = arith.addf %88, %89 : vector<4x256xf32>
    %cst_27 = arith.constant 1.000000e+00 : f32
    %91 = vector.broadcast %cst_27 : f32 to vector<4x256xf32>
    %92 = arith.subf %90, %91 : vector<4x256xf32>
    %93 = arith.subf %92, %7 : vector<4x256xf32>
    %94 = vector.shape_cast %93 : vector<4x256xf32> to vector<1x4x256xf32>
    %cst_28 = arith.constant dense<0.000000e+00> : vector<1xf32>
    %95 = vector.multi_reduction <add>, %94, %cst_28 [1, 2] : vector<1x4x256xf32> to vector<1xf32>
    %96 = vector.shape_cast %95 : vector<1xf32> to vector<1x1x1xf32>
    %97 = vector.extract %96[0, 0, 0] : f32 from vector<1x1x1xf32>
    %98 = vector.broadcast %97 : f32 to vector<1x1x1x1x1xf32>
    %c0_29 = arith.constant 0 : index
    %c0_30 = arith.constant 0 : index
    %c0_31 = arith.constant 0 : index
    %c0_32 = arith.constant 0 : index
    %c0_33 = arith.constant 0 : index
    %99 = vector.load %arg6[%c0_29, %c0_30, %c0_31, %c0_32, %c0_33] : memref<1x1x1x1x1xf32, #tpu.memory_space<vmem>>, vector<1x1x1x1x1xf32>
    tpu.vector_store %arg6[%c0_29, %c0_30, %c0_31, %c0_32, %c0_33], %98 {strides = array<i32>} : memref<1x1x1x1x1xf32, #tpu.memory_space<vmem>>, vector<1x1x1x1x1xf32>,
    return
  }
  func.func @transform_0(%arg0: i32, %arg1: i32, %arg2: i32, %arg3: memref<1xi32, #tpu.memory_space<smem>>) -> (i32, i32, i32, i32) {
    %c0_i32 = arith.constant 0 : i32
    %c0_i32_0 = arith.constant 0 : i32
    return %arg0, %c0_i32, %arg1, %arg2 : i32, i32, i32, i32
  }
  func.func @transform_1(%arg0: i32, %arg1: i32, %arg2: i32, %arg3: memref<1xi32, #tpu.memory_space<smem>>) -> (i32, i32, i32) {
    %c0_i32 = arith.constant 0 : i32
    return %arg0, %arg1, %arg2 : i32, i32, i32
  }
  func.func @transform_2(%arg0: i32, %arg1: i32, %arg2: i32, %arg3: memref<1xi32, #tpu.memory_space<smem>>) -> (i32, i32, i32, i32, i32) {
    %c0_i32 = arith.constant 0 : i32
    %c0_i32_0 = arith.constant 0 : i32
    %c0_i32_1 = arith.constant 0 : i32
    return %arg0, %arg1, %arg2, %c0_i32, %c0_i32_0 : i32, i32, i32, i32, i32
  }
}

</mosaic_0001>

<bundles_post_ra>
// kernel: diagonal_gaussian_distribution.1
= control target key start
LH: loop header
LB: loop body
LE: loop exit
PB: predicated region body
PF: predicated region fallthrough
CT: control target
= control target key end

     0   :  { %s662_s14 = smov 0   ;;  %s664_s15 = smov 0   ;;  %s723_s0 = inlined_call_operand.<no memory space> [shape: s32[1], index: 0, kind: input, shape index: {}]   ;;  %s724_s1 = inlined_call_operand.vmem [shape: f32[2,2,4,256], index: 1, kind: input, shape index: {}]   ;;  %s725_s2 = inlined_call_operand.vmem [shape: f32[2,4,256], index: 2, kind: output, shape index: {0}]   ;;  %s726_s3 = inlined_call_operand.vmem [shape: f32[2,1,1,1,1], index: 3, kind: output, shape index: {1}]  }
   0x1   :  { %9 = sst [smem:[#allocation3]] %s723_s0  ;;  %s666_s16 = smov 0  }
   0x2 LB: > { %s34_s0 = sadd.s32 1, %s633_s15  ;;  %p569_p0 = scmp.ge.s32.totalorder %s637_s16, 1  ;;  %s637_s16 = sphi %s666_s16, %s15_s16   ;;  %s633_s15 = sphi %s664_s15, %s728_s15   ;;  %s629_s14 = sphi %s662_s14, %s727_s14  }
   0x3   : > { %p36_p1 = scmp.ge.s32.totalorder %s34_s0, 2  ;;  %p157_p2 = scmp.lt.s32.totalorder %s637_s16, 3 }
   0x5   : > { %s730_s0 = smov (%p36_p1, %s34_s0), 0  ;;  %p158_p3 = pnand %p569_p0, %p157_p2 }
   0x6   : > { %p205_p4 = scmp.lt.s32.totalorder (!%p158_p3), %s629_s14, 1  ;;  %v249_v0 = vlaneseq (!%p158_p3)  ;;  %s575_s17 = sshll.u32 (!%p158_p3), %s629_s14, 2  ;;  %vm392_vm0 = vcmask (!%p158_p3), 1043456   ;;  %vm406_vm1 = vcmask (!%p158_p3), 0  }
   0x7   : > { %161 = sbr.rel (%p158_p3) target bundleno = 260 (0x104), region = 24  ;;  %v257_v1 = vstv (!%p158_p3), %s575_s17  ;;  %s266_s18 = sld [smem:[#allocation3]] (!%p158_p3) }
   0x8   : > { %v250_v2 = vshrl.u32 (!%p158_p3), %v249_v0, 7  ;;  %v252_v3 = vand.u32 (!%p158_p3), 127, %v249_v0 }
   0xa   : > { %v253_v4 = vadd.s32 (!%p158_p3), 128, %v252_v3  ;;  %v258_v5 = vadd.s32 (!%p158_p3), %v257_v1, %v250_v2 }
   0xc   : > { %v259_v7 = vmul.u32 (!%p158_p3), 256, %v258_v5 }
   0xd   : > { %s267_s23 = smul.u32 (!%p158_p3), 2654435769, %s266_s18 }
   0xe   : > { %s732_s14 = smov (!%p205_p4, %s629_s14), 1  ;;  %v264_v9 = vadd.s32 %v259_v7, %v252_v3  ;;  %v265_v10 = vadd.s32 %v259_v7, %v253_v4 }
   0xf   : > { %s585_s19 = sshll.u32 %s732_s14, 4  ;;  %v270_v12 = vstv %s267_s23  ;;  %s586_s24 = sshll.u32 %s732_s14, 3 }
  0x10   : > { %s686_s22 = scalar_lea.vmem %s724_s1, %s585_s19  ;;  %v268_v13 = vmul.u32 2, %v264_v9  ;;  %v269_v14 = vmul.u32 2, %v265_v10  ;;  %s230_s27 = scalar_lea.vmem %s725_s2, %s586_s24 }
  0x11   : > { %v574_v6 = vld [vmem:[%s686_s22 + $0x8] sm:$0xff]  ;;  %v693_v37 = vld [vmem:[%s686_s22] sm:$0xff]  ;;  %s240_s30 = scalar_lea.vmem %s726_s3, %s732_s14 }
  0x12   : > { %v244_v8 = vmax.f32 %v574_v6, -30.0  ;;  %v271_v16 = vadd.s32 %v270_v12, %v268_v13  ;;  %v272_v17 = vadd.s32 %v270_v12, %v269_v14  ;;  %v289_v18 = vadd.s32 1, %v268_v13 }
  0x13   : > { %v290_v19 = vadd.s32 1, %v269_v14  ;;  %v384_v47 = vmul.f32 %v693_v37, %v693_v37 }
  0x14   : > { %v689_v11 = vmin.f32 %v244_v8, 20.0  ;;  %v273_v21 = vshrl.u32 %v271_v16, 16  ;;  %v274_v22 = vshrl.u32 %v272_v17, 16  ;;  %v291_v23 = vadd.s32 %v289_v18, %v270_v12 }
  0x15   : > { %v292_v24 = vadd.s32 %v290_v19, %v270_v12 }
  0x16   : > { %v246_v15 = vmul.f32 0.5, %v689_v11  ;;  %v275_v25 = vxor.u32 %v273_v21, %v271_v16  ;;  %v276_v26 = vxor.u32 %v274_v22, %v272_v17  ;;  %v293_v27 = vshrl.u32 %v291_v23, 16 }
  0x17   : > { %v294_v28 = vshrl.u32 %v292_v24, 16 }
  0x18   : > { %v247_v20 = vmul.f32 1.442695, %v246_v15  ;;  %v277_v29 = vmul.u32 2146121005, %v275_v25  ;;  %v278_v30 = vmul.u32 2146121005, %v276_v26  ;;  %v295_v31 = vxor.u32 %v293_v27, %v291_v23 }
  0x19   : > { %v296_v32 = vxor.u32 %v294_v28, %v292_v24 }
  0x1a   : > { %613 = vpow2.f32 %v247_v20  ;;  %v279_v33 = vshrl.u32 %v277_v29, 15  ;;  %v280_v34 = vshrl.u32 %v278_v30, 15  ;;  %v297_v35 = vmul.u32 2146121005, %v295_v31 }
  0x1b   : > { %v298_v36 = vmul.u32 2146121005, %v296_v32 }
  0x1c   : > { %v281_v38 = vxor.u32 %v279_v33, %v277_v29  ;;  %v282_v39 = vxor.u32 %v280_v34, %v278_v30  ;;  %v299_v40 = vshrl.u32 %v297_v35, 15 }
  0x1d   : > { %v300_v41 = vshrl.u32 %v298_v36, 15 }
  0x1e   : > { %v283_v42 = vmul.u32 2221713035, %v281_v38  ;;  %v284_v43 = vmul.u32 2221713035, %v282_v39  ;;  %v301_v44 = vxor.u32 %v299_v40, %v297_v35 }
  0x1f   : > { %v302_v45 = vxor.u32 %v300_v41, %v298_v36 }
  0x20   : > { %v285_v48 = vshrl.u32 %v283_v42, 16  ;;  %v286_v49 = vshrl.u32 %v284_v43, 16  ;;  %v303_v50 = vmul.u32 2221713035, %v301_v44 }
  0x21   : > { %v304_v51 = vmul.u32 2221713035, %v302_v45 }
  0x22   : > { %v287_v53 = vxor.u32 %v285_v48, %v283_v42  ;;  %v288_v54 = vxor.u32 %v286_v49, %v284_v43  ;;  %v305_v55 = vshrl.u32 %v303_v50, 16 }
  0x23   : > { %v306_v56 = vshrl.u32 %v304_v51, 16 }
  0x24   : > { %v695_v46 = vpop.eup %613  ;;  %v307_v58 = vxor.u32 %v305_v55, %v303_v50  ;;  %v309_v60 = vshrl.u32 %v287_v53, 16  ;;  %v310_v61 = vshrl.u32 %v288_v54, 16  ;;  %v323_v62 = vand.u32 65535, %v287_v53 }
  0x25   : > { %v385_v52 = vmul.f32 %v695_v46, %v695_v46  ;;  %v308_v59 = vxor.u32 %v306_v56, %v304_v51  ;;  %v324_v63 = vand.u32 65535, %v288_v54 }
  0x26   : > { %v311_v0 = vshrl.u32 %v309_v60, 16  ;;  %v315_v1 = vcvt.s32.f32 %v309_v60  ;;  %v317_v2 = vshrl.u32 %v310_v61, 16  ;;  %v321_v4 = vcvt.s32.f32 %v310_v61 }
  0x27   : > { %v386_v57 = vadd.f32 %v385_v52, %v384_v47  ;;  %v325_v5 = vshrl.u32 %v323_v62, 16  ;;  %v329_v6 = vcvt.s32.f32 %v323_v62  ;;  %v331_v7 = vshrl.u32 %v324_v63, 16 }
  0x28   : > { %v313_v8 = vcvt.s32.f32 %v311_v0  ;;  %v319_v9 = vcvt.s32.f32 %v317_v2  ;;  %v337_v10 = vshrl.u32 %v307_v58, 16  ;;  %v338_v12 = vshrl.u32 %v308_v59, 16 }
  0x29   : > { %v582_v3 = vadd.f32 -1.0, %v386_v57  ;;  %v327_v13 = vcvt.s32.f32 %v325_v5  ;;  %v333_v14 = vcvt.s32.f32 %v331_v7  ;;  %v335_v15 = vcvt.s32.f32 %v324_v63 }
  0x2a   : > { %v351_v16 = vand.u32 65535, %v307_v58  ;;  %v314_v17 = vmul.f32 65536.0, %v313_v8  ;;  %v320_v18 = vmul.f32 65536.0, %v319_v9  ;;  %v339_v19 = vshrl.u32 %v337_v10, 16 }
  0x2b   : > { %v352_v20 = vand.u32 65535, %v308_v59  ;;  %v328_v21 = vmul.f32 65536.0, %v327_v13  ;;  %v334_v22 = vmul.f32 65536.0, %v333_v14  ;;  %v343_v23 = vcvt.s32.f32 %v337_v10 }
  0x2c   : > { %v345_v24 = vshrl.u32 %v338_v12, 16  ;;  %v316_v25 = vadd.f32 %v315_v1, %v314_v17  ;;  %v322_v26 = vadd.f32 %v321_v4, %v320_v18  ;;  %v341_v27 = vcvt.s32.f32 %v339_v19 }
  0x2d   : > { %v353_v28 = vshrl.u32 %v351_v16, 16  ;;  %v330_v29 = vadd.f32 %v329_v6, %v328_v21  ;;  %v336_v30 = vadd.f32 %v335_v15, %v334_v22  ;;  %v349_v32 = vcvt.s32.f32 %v338_v12 }
  0x2e   : > { %v347_v31 = vcvt.s32.f32 %v345_v24  ;;  %v342_v33 = vmul.f32 65536.0, %v341_v27  ;;  %v357_v35 = vcvt.s32.f32 %v351_v16  ;;  %v359_v36 = vshrl.u32 %v352_v20, 16 }
  0x2f   : > { %v355_v34 = vcvt.s32.f32 %v353_v28  ;;  %v365_v39 = vadd.f32 %v330_v29, %v316_v25  ;;  %v366_v40 = vadd.f32 %v336_v30, %v322_v26  ;;  %v388_v41 = vsub.f32 %v582_v3, %v689_v11 }
  0x30   : > { %v348_v38 = vmul.f32 65536.0, %v347_v31  ;;  %v344_v42 = vadd.f32 %v343_v23, %v342_v33  ;;  %v361_v44 = vcvt.s32.f32 %v359_v36  ;;  %v363_v45 = vcvt.s32.f32 %v352_v20 }
  0x31   : > { %v356_v43 = vmul.f32 65536.0, %v355_v34  ;;  %v390_v48 = vcombine.high %v388_v41, %v388_v41  ;;  %v393_v49 = vsel %vm392_vm0, %v388_v41, 0.0 }
  0x32   : > { %v350_v47 = vadd.f32 %v349_v32, %v348_v38  ;;  %v362_v51 = vmul.f32 65536.0, %v361_v44  ;;  %v367_v52 = vadd.f32 %v365_v39, %v344_v42 }
  0x33   : > { %v358_v50 = vadd.f32 %v357_v35, %v356_v43  ;;  %v394_v54 = vsel %vm392_vm0, %v390_v48, 0.0 }
  0x34   : > { %v368_v53 = vadd.f32 %v366_v40, %v350_v47  ;;  %v364_v55 = vadd.f32 %v363_v45, %v362_v51  ;;  %v395_v57 = vadd.f32 %v394_v54, %v393_v49 }
  0x35   : > { %v369_v56 = vadd.f32 %v367_v52, %v358_v50 }
  0x36   : > { %v370_v58 = vadd.f32 %v368_v53, %v364_v55  ;;  %396 = vadd.xlane.f32.xlu0 %v395_v57 }
  0x37   : > { %v371_v11 = vmul.f32 1.5258789e-05, %v369_v56 }
  0x38   : > { %v372_v59 = vmul.f32 1.5258789e-05, %v370_v58 }
  0x39   : > { %v580_v60 = vadd.f32 -2.0, %v371_v11 }
  0x3a   : > { %v581_v61 = vadd.f32 -2.0, %v372_v59 }
  0x3b   : > { %v375_v62 = vmul.f32 1.7320508, %v580_v60 }
  0x3c   : > { %v376_v63 = vmul.f32 1.7320508, %v581_v61 }
  0x3e   : > { %v379_v0 = vcombine.low %v375_v62, %v376_v63 }
  0x40   : > { %v381_v1 = vmul.f32 %v695_v46, %v379_v0 }
  0x42   : > { %v382_v2 = vadd.f32 %v381_v1, %v693_v37 }
  0x44   : > { %383 = vst [vmem:[%s230_s27] sm:$0xff] %v382_v2 }
  0xc3   : > { %v397_v3 = vpop.xlane.xlu0 %396 }
  0xc4   : > { %v398_v4 = vrot.slane %v397_v3, 4 }
  0xc6   : > { %v399_v5 = vadd.f32 %v398_v4, %v397_v3 }
  0xc8   : > { %v400_v6 = vrot.slane %v399_v5, 2 }
  0xca   : > { %v401_v7 = vadd.f32 %v400_v6, %v399_v5 }
  0xcc   : > { %v402_v8 = vrot.slane %v401_v7, 1 }
  0xce   : > { %v403_v9 = vadd.f32 %v402_v8, %v401_v7 }
  0xd0   : > { %587 = vpush %v403_v9 }
 0x101   : > { %s588_s4 = spop %587 }
 0x102   : > { %v405_v46 = vstv %s588_s4 }
 0x103   : > { %407 = vst.msk [vmem:[%s240_s30] sm:$0x1] %vm406_vm1, %v405_v46 }
 0x104 PF: > { %s15_s16 = sadd.s32 1, %s637_s16   ;;  %s727_s14 = smov %s633_s15 }
 0x105   : > { %p12_p5 = scmp.ge.s32.totalorder %s15_s16, 4   ;;  %s728_s15 = smov %s730_s0 }
 0x107   :  { %14 = sbr.rel (!%p12_p5) target bundleno = 2 (0x2), region = 67 }

</bundles_post_ra>
